<compile_context>
chip_gen: v6e
topology: v6e:2x2x1
jax: 0.10.0
libtpu: 0.0.40
codegen_flags: <defaults>
</compile_context>

<pallas_src>
import math
from functools import partial

import numpy as np
import jax
import jax.numpy as jnp
from jax.experimental import pallas as pl
from jax.experimental.pallas import tpu as pltpu


def _round_up(x, m):
    return -(-x // m) * m


def _cdiv(a, b):
    return -(-a // b)


def _pair(v):
    return (v, v) if isinstance(v, int) else tuple(v)


# ----------------------------------------------------------------------------
# Pallas kernel: per-lane-tile Lorentz "linearized kernel"
# ----------------------------------------------------------------------------
def _lorentz_patch_linear_kernel(time_ref, space_ref, wsT_ref, wtb_ref, o_ref,
                                 *, c, n_taps, oc):
    # time_ref : [n_taps, TN]  time taps, already clamped to >= sqrt(c)
    # space_ref: [S, TN]       space taps, tap-major / channel-minor rows
    # wsT_ref  : [OC, S]       space weight block (gathered per phase)
    # wtb_ref  : [OC, 2]       col 0 = time-feature weight, col 1 = bias (f32)
    # o_ref    : [OCpad, TN]   rows [0,OC) = space, rows [OC,OCpad) = time
    t = time_ref[...].astype(jnp.float32)
    t_rescaled = jnp.sqrt(jnp.sum(t * t, axis=0, keepdims=True)
                          - (n_taps - 1) * c)                       # [1, TN]

    out_space = jnp.dot(wsT_ref[...], space_ref[...],
                        preferred_element_type=jnp.float32)         # [OC, TN]
    wt = wtb_ref[:, 0:1].astype(jnp.float32)                        # [OC, 1]
    b = wtb_ref[:, 1:2].astype(jnp.float32)                         # [OC, 1]
    out_space = out_space + wt * t_rescaled + b

    out_time = jnp.sqrt(jnp.sum(out_space * out_space, axis=0, keepdims=True)
                        + c)                                        # [1, TN]

    # static-slice stores; space starts at sublane 0, time fills the rest
    o_ref[0:oc, :] = out_space
    o_ref[oc:, :] = jnp.broadcast_to(out_time,
                                     (o_ref.shape[0] - oc, out_time.shape[1]))


# ----------------------------------------------------------------------------
# Phase geometry (stride-phase / sub-pixel decomposition of the transposed conv)
# ----------------------------------------------------------------------------
def _phase_taps_1d(k, s, pad_implicit, out_len):
    """For each output phase r = out_index mod s: (r, #outputs, [(tap d, off)]),
    where the tap reads original-input index q + off for output q-th row of
    that phase.  Taps not listed fall on zero-inserted pixels (time -> sqrt(c),
    space -> 0) and are folded analytically into the time rescale term."""
    phases = []
    for r in range(s):
        n_out = len(range(r, out_len, s))
        taps = []
        for d in range(k):
            if (r + d - pad_implicit) % s == 0:
                taps.append((d, (r + d - pad_implicit) // s))
        phases.append((r, n_out, taps))
    return phases


# ----------------------------------------------------------------------------
# VMEM budget / tiling
# ----------------------------------------------------------------------------
def _vmem_capacity_bytes():
    try:
        return int(pltpu.get_tpu_info().vmem_capacity_bytes)
    except Exception:
        return 64 * 2**20  # conservative fallback (v7x per-core VMEM)


def _pick_tile(n, per_lane_bytes, weight_bytes, tile_n):
    cap = _vmem_capacity_bytes()
    budget = min(int(0.40 * cap), 48 * 2**20)  # ~25 MiB on v7x, 48 MiB v5e/v6e
    avail = max(budget - weight_bytes, 0)
    tile_max = max(128, (avail // max(per_lane_bytes, 1)) // 128 * 128)
    if tile_n is not None:
        tile_max = min(tile_max, max(128, _round_up(int(tile_n), 128)))
    tile = min(tile_max, _round_up(n, 128))
    # keep >= 2 grid steps so the "parallel" axis can split across v7x's 2 TCs
    if n > 128:
        tile = min(tile, _round_up(_cdiv(n, 2), 128))
    return max(128, tile)


# ----------------------------------------------------------------------------
# One phase = one pallas_call over lane tiles of N_phase
# ----------------------------------------------------------------------------
def _run_phase(time_p, space_p, wsT, wtb, *, c, oc, n_taps, stream_dtype,
               single_buffer_weights, tile_n):
    s_p = space_p.shape[0]
    n = time_p.shape[1]
    oc_pad = _round_up(oc + 1, 8)

    sbytes = jnp.dtype(stream_dtype).itemsize
    per_lane = 2 * ((n_taps + s_p) * sbytes + oc_pad * 4)   # double-buffered
    weight_bytes = (1 if single_buffer_weights else 2) * (oc * s_p * sbytes
                                                          + oc * 2 * 4)
    tile = _pick_tile(n, per_lane, weight_bytes, tile_n)
    np_ = _round_up(n, tile)
    grid = np_ // tile

    # lane padding: finite dummy Lorentz-ish values (padded lanes are sliced off)
    time_pad = math.sqrt(c) + 1.0
    time_p = jnp.pad(time_p, ((0, 0), (0, np_ - n)),
                     constant_values=time_pad).astype(stream_dtype)
    space_p = jnp.pad(space_p, ((0, 0), (0, np_ - n))).astype(stream_dtype)
    wsT = wsT.astype(stream_dtype)
    wtb = wtb.astype(jnp.float32)           # tiny; keep bias/time weight exact

    footprint = per_lane * tile + weight_bytes
    vmem_limit = int(min(max(2 * footprint, 16 * 2**20),
                         int(0.45 * _vmem_capacity_bytes())))

    if single_buffer_weights:
        def w_spec(shape):
            return pl.BlockSpec(shape, lambda i: (0, 0),
                                pipeline_mode=pl.Buffered(1))
    else:
        def w_spec(shape):
            return pl.BlockSpec(shape, lambda i: (0, 0))

    cost = pl.CostEstimate(
        flops=int(2 * oc * s_p * np_ + 6 * (oc + n_taps) * np_),
        transcendentals=int(2 * np_),
        bytes_accessed=int((n_taps + s_p) * np_ * sbytes + oc_pad * np_ * 4
                           + oc * (s_p + 2) * sbytes))

    out = pl.pallas_call(
        partial(_lorentz_patch_linear_kernel, c=c, n_taps=n_taps, oc=oc),
        out_shape=jax.ShapeDtypeStruct((oc_pad, np_), jnp.float32),
        grid_spec=pltpu.PrefetchScalarGridSpec(
            num_scalar_prefetch=0,
            grid=(grid,),
            in_specs=[
                pl.BlockSpec((n_taps, tile), lambda i: (0, i)),
                pl.BlockSpec((s_p, tile), lambda i: (0, i)),
                w_spec((oc, s_p)),
                w_spec((oc, 2)),
            ],
            out_specs=pl.BlockSpec((oc_pad, tile), lambda i: (0, i)),
        ),
        compiler_params=pltpu.CompilerParams(
            dimension_semantics=("parallel",),
            vmem_limit_bytes=vmem_limit),
        cost_estimate=cost,
    )(time_p, space_p, wsT, wtb)

    out_space = out[:oc, :n]          # [OC, N]
    out_time = out[oc:oc + 1, :n]     # [1, N]
    return out_time, out_space


# ----------------------------------------------------------------------------
# Forward (phase-decomposed)
# ----------------------------------------------------------------------------
def _forward(x, weight, bias, *, kernel_size, stride, padding, output_padding,
             c, stream_dtype, tile_n, single_buffer_weights):
    kh, kw = kernel_size
    sh, sw = stride
    ph_, pw_ = padding
    B, H, W, C = x.shape
    OC = weight.shape[0]
    sqrt_c = math.sqrt(c)

    pih, piw = kh - ph_ - 1, kw - pw_ - 1
    h_out = (H - 1) * sh + kh - 2 * ph_
    w_out = (W - 1) * sw + kw - 2 * pw_

    row_phases = _phase_taps_1d(kh, sh, pih, h_out)
    col_phases = _phase_taps_1d(kw, sw, piw, w_out)

    # pad the ORIGINAL input just enough to cover every phase's taps, then
    # clamp channel 0 (matches the reference's per-patch clamp, incl. padding)
    pad_t = max([0] + [-o for _, _, t in row_phases for _, o in t])
    pad_b = max([0] + [(n - 1 + o) - (H - 1)
                       for _, n, t in row_phases for _, o in t])
    pad_l = max([0] + [-o for _, _, t in col_phases for _, o in t])
    pad_r = max([0] + [(n - 1 + o) - (W - 1)
                       for _, n, t in col_phases for _, o in t])
    xp = jnp.pad(x, ((0, 0), (pad_t, pad_b), (pad_l, pad_r), (0, 0)))
    xp = xp.at[..., 0].set(jnp.maximum(xp[..., 0], sqrt_c))

    w_space = weight[:, 1:]                               # [OC, (C-1)*K]
    wtb = jnp.stack([weight[:, 0], bias], axis=1)         # [OC, 2]

    out = jnp.zeros((B, h_out, w_out, OC + 1), jnp.float32)

    for rh, nq, rtaps in row_phases:
        if nq == 0:
            continue
        for rw, nw, ctaps in col_phases:
            if nw == 0:
                continue
            taps = [(di, oi, dj, oj) for (di, oi) in rtaps
                    for (dj, oj) in ctaps]
            n_taps = len(taps)
            N = B * nq * nw

            if n_taps == 0:
                # every tap of this phase sits on a zero-inserted pixel
                osp = weight[:, 0] * sqrt_c + bias                    # [OC]
                oti = jnp.sqrt(jnp.sum(osp * osp) + c)                # []
                ph_out = jnp.broadcast_to(
                    jnp.concatenate([oti[None], osp]), (B, nq, nw, OC + 1))
                out = out.at[:, rh::sh, rw::sw, :].set(ph_out)
                continue

            # lane-dense (feature-major) patch matrices for this phase
            wins = [xp[:, pad_t + oi: pad_t + oi + nq,
                        pad_l + oj: pad_l + oj + nw, :]
                    for (di, oi, dj, oj) in taps]
            patch = jnp.stack(wins, axis=0)               # [T, B, nq, nw, C]
            time_p = patch[..., 0].reshape(n_taps, N)
            space_p = jnp.moveaxis(patch[..., 1:], -1, 1).reshape(
                n_taps * (C - 1), N)                      # tap-major, ch-minor

            # gather the matching weight columns (torch order: k-major, c-minor)
            cols = np.asarray([(di * kw + dj) * (C - 1) + cc
                               for (di, oi, dj, oj) in taps
                               for cc in range(C - 1)])
            wsT = w_space[:, cols]                        # [OC, T*(C-1)]

            o_time, o_space = _run_phase(
                time_p, space_p, wsT, wtb, c=c, oc=OC, n_taps=n_taps,
                stream_dtype=stream_dtype,
                single_buffer_weights=single_buffer_weights, tile_n=tile_n)

            ph_out = jnp.concatenate([o_time, o_space], axis=0)  # [OC+1, N]
            ph_out = jnp.transpose(ph_out.reshape(OC + 1, B, nq, nw),
                                   (1, 2, 3, 0))
            out = out.at[:, rh::sh, rw::sw, :].set(ph_out)

    oph, opw = output_padding
    if oph > 0 or opw > 0:
        # Faithful to the torch reference: F.pad on a channel-last tensor pads
        # the LAST dim (channels) by opw and W by oph, then clamps channel 0.
        out = jnp.pad(out, ((0, 0), (0, 0), (0, oph), (0, opw)))
        out = out.at[..., 0].set(jnp.maximum(out[..., 0], sqrt_c))
    return out


def lorentz_conv_transpose2d(x, weight, bias, *, kernel_size, stride=1,
                             padding=0, output_padding=0, c=1.0,
                             stream_dtype=jnp.bfloat16, tile_n=None):
    """x: [B, H, W, C] channel-last.  weight: [OC, 1+(C-1)*kh*kw].  bias: [OC]."""
    kwargs = dict(kernel_size=_pair(kernel_size), stride=_pair(stride),
                  padding=_pair(padding), output_padding=_pair(output_padding),
                  c=float(c), stream_dtype=stream_dtype, tile_n=tile_n)
    try:
        return _forward(x, weight, bias, single_buffer_weights=True, **kwargs)
    except Exception:
        # pl.Buffered(1) pipeline_mode not supported on this jax/Mosaic
        # version -> fall back to default double-buffered weight operands.
        return _forward(x, weight, bias, single_buffer_weights=False, **kwargs)


# ----------------------------------------------------------------------------
# Pure-JAX reference (straightforward dilation + im2col, independent path)
# ----------------------------------------------------------------------------
def _dilate_and_pad(x, *, kernel_size, stride, padding, c):
    kh, kw = kernel_size
    sh, sw = stride
    ph_, pw_ = padding
    B, H, W, C = x.shape
    sqrt_c = math.sqrt(c)

    if sh > 1 or sw > 1:
        Hd, Wd = (H - 1) * sh + 1, (W - 1) * sw + 1
        xd = jnp.zeros((B, Hd, Wd, C), x.dtype).at[:, ::sh, ::sw, :].set(x)
        xd = xd.at[..., 0].set(jnp.maximum(xd[..., 0], sqrt_c))
        x = xd
        H, W = Hd, Wd

    pih, piw = kh - ph_ - 1, kw - pw_ - 1
    h_out = H + 2 * pih - (kh - 1)
    w_out = W + 2 * piw - (kw - 1)
    xp = jnp.pad(x, ((0, 0), (pih, pih), (piw, piw), (0, 0)))
    return xp, h_out, w_out


def _reference(x, weight, bias, *, kernel_size, stride, padding,
               output_padding, c):
    kh, kw = _pair(kernel_size)
    stride, padding, output_padding = _pair(stride), _pair(padding), _pair(output_padding)
    C = x.shape[-1]
    K = kh * kw
    sqrt_c = math.sqrt(c)

    xp, h_out, w_out = _dilate_and_pad(x, kernel_size=(kh, kw), stride=stride,
                                       padding=padding, c=c)
    B = xp.shape[0]
    windows = [xp[:, di:di + h_out, dj:dj + w_out, :]
               for di in range(kh) for dj in range(kw)]
    patch = jnp.stack(windows, axis=3)                    # [B,ho,wo,K,C]
    N = B * h_out * w_out
    time_p = patch[..., 0].reshape(N, K)
    space_p = patch[..., 1:].reshape(N, (C - 1) * K)      # k-major, c-minor

    t = jnp.maximum(time_p, sqrt_c)
    t_r = jnp.sqrt(jnp.sum(t * t, -1, keepdims=True) - (K - 1) * c)
    feat = jnp.concatenate([t_r, space_p], axis=-1)
    out_space = jnp.dot(feat, weight.T,
                        precision=jax.lax.Precision.HIGHEST) + bias
    out_time = jnp.sqrt(jnp.sum(out_space ** 2, -1, keepdims=True) + c)
    out = jnp.concatenate([out_time, out_space], -1).reshape(B, h_out, w_out, -1)

    oph, opw = output_padding
    if oph > 0 or opw > 0:
        out = jnp.pad(out, ((0, 0), (0, 0), (0, oph), (0, opw)))
        out = out.at[..., 0].set(jnp.maximum(out[..., 0], sqrt_c))
    return out


# ----------------------------------------------------------------------------
# Demo / self-test
# ----------------------------------------------------------------------------
if __name__ == "__main__":
    key = jax.random.PRNGKey(0)
    B, C_in, H, W = 2, 4, 16, 16        # in_channels=4 (includes time)
    OC = 4                              # out_channels (excluding time)
    c = 1.0

    k1, k2, k3 = jax.random.split(key, 3)

    # valid Lorentz points: space ~ N(0,1), time = sqrt(|space|^2 + c)
    space = jax.random.normal(k1, (B, H, W, C_in - 1), jnp.float32)
    time = jnp.sqrt(jnp.sum(space ** 2, -1, keepdims=True) + c)
    x = jnp.concatenate([time, space], axis=-1)           # [B, H, W, C_in]

    kernel_size = (3, 3)
    K = kernel_size[0] * kernel_size[1]
    lin_features = (C_in - 1) * K + 1
    stdv = math.sqrt(2.0 / ((C_in - 1) * K))
    weight = jax.random.uniform(k2, (OC, lin_features), jnp.float32, -stdv, stdv)
    bias = jax.random.uniform(k3, (OC,), jnp.float32, -stdv, stdv)

    # --- config A: stride 2, padding 1 (the module's typical upsampling use) --
    cfgA = dict(kernel_size=kernel_size, stride=(2, 2), padding=(1, 1),
                output_padding=(0, 0), c=c)
    ref_a = _reference(x, weight, bias, **cfgA)

    out_f32 = lorentz_conv_transpose2d(x, weight, bias,
                                       stream_dtype=jnp.float32, **cfgA)
    out_f32 = jax.block_until_ready(out_f32)

    out_bf16 = lorentz_conv_transpose2d(x, weight, bias, **cfgA)  # bf16 streams
    out_bf16 = jax.block_until_ready(out_bf16)

    expected_h = (H - 1) * 2 + 3 - 2 * 1
    expected_w = (W - 1) * 2 + 3 - 2 * 1
    assert out_f32.shape == (B, expected_h, expected_w, OC + 1), out_f32.shape
    assert bool(jnp.all(jnp.isfinite(out_f32)))
    assert bool(jnp.all(jnp.isfinite(out_bf16)))
    assert bool(jnp.allclose(out_f32, ref_a, rtol=5e-3, atol=5e-3))
    assert bool(jnp.allclose(out_bf16, ref_a, rtol=2.5e-2, atol=2.5e-2))

    # --- config B: stride 2, padding 0 (exercises border/halo handling) ------
    cfgB = dict(kernel_size=kernel_size, stride=(2, 2), padding=(0, 0),
                output_padding=(0, 0), c=c)
    ref_b = _reference(x, weight, bias, **cfgB)
    out_b = lorentz_conv_transpose2d(x, weight, bias,
                                     stream_dtype=jnp.float32, **cfgB)
    out_b = jax.block_until_ready(out_b)
    assert out_b.shape == ref_b.shape, (out_b.shape, ref_b.shape)
    assert bool(jnp.allclose(out_b, ref_b, rtol=5e-3, atol=5e-3))

    # --- config C: stride 1 (single phase, degenerates to LorentzConv2d) -----
    cfgC = dict(kernel_size=kernel_size, stride=(1, 1), padding=(1, 1),
                output_padding=(0, 0), c=c)
    ref_c = _reference(x, weight, bias, **cfgC)
    out_c = lorentz_conv_transpose2d(x, weight, bias,
                                     stream_dtype=jnp.float32, **cfgC)
    out_c = jax.block_until_ready(out_c)
    assert out_c.shape == ref_c.shape, (out_c.shape, ref_c.shape)
    assert bool(jnp.allclose(out_c, ref_c, rtol=5e-3, atol=5e-3))

    print("KERNEL_OK")
</pallas_src>

<mosaic_0001>
module attributes {stable_mosaic.version = 11 : i64} {
  func.func @_lorentz_patch_linear_kernel(%arg0: i32, %arg1: memref<1x256xf32, #tpu.memory_space<vmem>>, %arg2: memref<3x256xf32, #tpu.memory_space<vmem>>, %arg3: memref<4x3xf32, #tpu.memory_space<vmem>>, %arg4: memref<4x2xf32, #tpu.memory_space<vmem>>, %arg5: memref<8x256xf32, #tpu.memory_space<vmem>>) attributes {dimension_semantics = [#tpu.dimension_semantics<parallel>], iteration_bounds = array<i64: 2>, scalar_prefetch = 0 : i64, scratch_operands = 0 : i64, tpu.core_type = #tpu.core_type<tc>, window_params = [{transform_indices = @transform_0, window_bounds = array<i64: 1, 256>}, {transform_indices = @transform_1, window_bounds = array<i64: 3, 256>}, {pipeline_mode = #tpu.pipeline_mode<synchronous>, transform_indices = @transform_2, window_bounds = array<i64: 4, 3>}, {pipeline_mode = #tpu.pipeline_mode<synchronous>, transform_indices = @transform_3, window_bounds = array<i64: 4, 2>}, {transform_indices = @transform_4, window_bounds = array<i64: 8, 256>}]} {
    %c0 = arith.constant 0 : index
    %c0_0 = arith.constant 0 : index
    %0 = vector.load %arg1[%c0, %c0_0] : memref<1x256xf32, #tpu.memory_space<vmem>>, vector<1x256xf32>
    %1 = arith.mulf %0, %0 : vector<1x256xf32>
    %cst = arith.constant dense<0.000000e+00> : vector<256xf32>
    %2 = vector.multi_reduction <add>, %1, %cst [0] : vector<1x256xf32> to vector<256xf32>
    %3 = vector.shape_cast %2 : vector<256xf32> to vector<1x256xf32>
    %cst_1 = arith.constant 0.000000e+00 : f32
    %4 = vector.broadcast %cst_1 : f32 to vector<1x256xf32>
    %5 = arith.subf %3, %4 : vector<1x256xf32>
    %6 = math.sqrt %5 : vector<1x256xf32>
    %c0_2 = arith.constant 0 : index
    %c0_3 = arith.constant 0 : index
    %7 = vector.load %arg3[%c0_2, %c0_3] : memref<4x3xf32, #tpu.memory_space<vmem>>, vector<4x3xf32>
    %c0_4 = arith.constant 0 : index
    %c0_5 = arith.constant 0 : index
    %8 = vector.load %arg2[%c0_4, %c0_5] : memref<3x256xf32, #tpu.memory_space<vmem>>, vector<3x256xf32>
    %cst_6 = arith.constant dense<0.000000e+00> : vector<4x256xf32>
    %9 = tpu.matmul %7, %8, %cst_6 {dimension_numbers = #tpu.dot_dimension_numbers<[1], [0], [0], [1], [0, 0, 1, 1], [], []>} : vector<4x3xf32>, vector<3x256xf32>, vector<4x256xf32> -> vector<4x256xf32>
    %c0_7 = arith.constant 0 : index
    %c0_8 = arith.constant 0 : index
    %10 = vector.load %arg4[%c0_7, %c0_8] : memref<4x2xf32, #tpu.memory_space<vmem>>, vector<4x1xf32>
    %c0_9 = arith.constant 0 : index
    %c1 = arith.constant 1 : index
    %11 = vector.load %arg4[%c0_9, %c1] : memref<4x2xf32, #tpu.memory_space<vmem>>, vector<4x1xf32>
    %12 = vector.broadcast %10 : vector<4x1xf32> to vector<4x256xf32>
    %13 = vector.broadcast %6 : vector<1x256xf32> to vector<4x256xf32>
    %14 = arith.mulf %12, %13 : vector<4x256xf32>
    %15 = arith.addf %9, %14 : vector<4x256xf32>
    %16 = vector.broadcast %11 : vector<4x1xf32> to vector<4x256xf32>
    %17 = arith.addf %15, %16 : vector<4x256xf32>
    %18 = arith.mulf %17, %17 : vector<4x256xf32>
    %cst_10 = arith.constant dense<0.000000e+00> : vector<256xf32>
    %19 = vector.multi_reduction <add>, %18, %cst_10 [0] : vector<4x256xf32> to vector<256xf32>
    %20 = vector.shape_cast %19 : vector<256xf32> to vector<1x256xf32>
    %cst_11 = arith.constant 1.000000e+00 : f32
    %21 = vector.broadcast %cst_11 : f32 to vector<1x256xf32>
    %22 = arith.addf %20, %21 : vector<1x256xf32>
    %23 = math.sqrt %22 : vector<1x256xf32>
    %c0_12 = arith.constant 0 : index
    %c0_13 = arith.constant 0 : index
    %24 = vector.load %arg5[%c0_12, %c0_13] : memref<8x256xf32, #tpu.memory_space<vmem>>, vector<4x256xf32>
    tpu.vector_store %arg5[%c0_12, %c0_13], %17 {strides = array<i32>} : memref<8x256xf32, #tpu.memory_space<vmem>>, vector<4x256xf32>,
    %25 = vector.shape_cast %23 : vector<1x256xf32> to vector<1x256xf32>
    %26 = vector.broadcast %25 : vector<1x256xf32> to vector<4x256xf32>
    %c4 = arith.constant 4 : index
    %c0_14 = arith.constant 0 : index
    %27 = vector.load %arg5[%c4, %c0_14] : memref<8x256xf32, #tpu.memory_space<vmem>>, vector<4x256xf32>
    tpu.vector_store %arg5[%c4, %c0_14], %26 {strides = array<i32>} : memref<8x256xf32, #tpu.memory_space<vmem>>, vector<4x256xf32>,
    return
  }
  func.func @transform_0(%arg0: i32) -> (i32, i32) {
    %c0_i32 = arith.constant 0 : i32
    %c0_i32_0 = arith.constant 0 : i32
    return %c0_i32, %arg0 : i32, i32
  }
  func.func @transform_1(%arg0: i32) -> (i32, i32) {
    %c0_i32 = arith.constant 0 : i32
    %c0_i32_0 = arith.constant 0 : i32
    return %c0_i32, %arg0 : i32, i32
  }
  func.func @transform_2(%arg0: i32) -> (i32, i32) {
    %c0_i32 = arith.constant 0 : i32
    %c0_i32_0 = arith.constant 0 : i32
    %c0_i32_1 = arith.constant 0 : i32
    return %c0_i32, %c0_i32_0 : i32, i32
  }
  func.func @transform_3(%arg0: i32) -> (i32, i32) {
    %c0_i32 = arith.constant 0 : i32
    %c0_i32_0 = arith.constant 0 : i32
    %c0_i32_1 = arith.constant 0 : i32
    return %c0_i32, %c0_i32_0 : i32, i32
  }
  func.func @transform_4(%arg0: i32) -> (i32, i32) {
    %c0_i32 = arith.constant 0 : i32
    %c0_i32_0 = arith.constant 0 : i32
    return %c0_i32, %arg0 : i32, i32
  }
}

module attributes {stable_mosaic.version = 11 : i64} {
  func.func @_lorentz_patch_linear_kernel(%arg0: i32, %arg1: memref<1x256xf32, #tpu.memory_space<vmem>>, %arg2: memref<3x256xf32, #tpu.memory_space<vmem>>, %arg3: memref<4x3xf32, #tpu.memory_space<vmem>>, %arg4: memref<4x2xf32, #tpu.memory_space<vmem>>, %arg5: memref<8x256xf32, #tpu.memory_space<vmem>>) attributes {dimension_semantics = [#tpu.dimension_semantics<parallel>], iteration_bounds = array<i64: 2>, scalar_prefetch = 0 : i64, scratch_operands = 0 : i64, tpu.core_type = #tpu.core_type<tc>, window_params = [{transform_indices = @transform_0, window_bounds = array<i64: 1, 256>}, {transform_indices = @transform_1, window_bounds = array<i64: 3, 256>}, {pipeline_mode = #tpu.pipeline_mode<synchronous>, transform_indices = @transform_2, window_bounds = array<i64: 4, 3>}, {pipeline_mode = #tpu.pipeline_mode<synchronous>, transform_indices = @transform_3, window_bounds = array<i64: 4, 2>}, {transform_indices = @transform_4, window_bounds = array<i64: 8, 256>}]} {
    %c0 = arith.constant 0 : index
    %c0_0 = arith.constant 0 : index
    %0 = vector.load %arg1[%c0, %c0_0] : memref<1x256xf32, #tpu.memory_space<vmem>>, vector<1x256xf32>
    %1 = arith.mulf %0, %0 : vector<1x256xf32>
    %cst = arith.constant dense<0.000000e+00> : vector<256xf32>
    %2 = vector.multi_reduction <add>, %1, %cst [0] : vector<1x256xf32> to vector<256xf32>
    %3 = vector.shape_cast %2 : vector<256xf32> to vector<1x256xf32>
    %cst_1 = arith.constant 0.000000e+00 : f32
    %4 = vector.broadcast %cst_1 : f32 to vector<1x256xf32>
    %5 = arith.subf %3, %4 : vector<1x256xf32>
    %6 = math.sqrt %5 : vector<1x256xf32>
    %c0_2 = arith.constant 0 : index
    %c0_3 = arith.constant 0 : index
    %7 = vector.load %arg3[%c0_2, %c0_3] : memref<4x3xf32, #tpu.memory_space<vmem>>, vector<4x3xf32>
    %c0_4 = arith.constant 0 : index
    %c0_5 = arith.constant 0 : index
    %8 = vector.load %arg2[%c0_4, %c0_5] : memref<3x256xf32, #tpu.memory_space<vmem>>, vector<3x256xf32>
    %cst_6 = arith.constant dense<0.000000e+00> : vector<4x256xf32>
    %9 = tpu.matmul %7, %8, %cst_6 {dimension_numbers = #tpu.dot_dimension_numbers<[1], [0], [0], [1], [0, 0, 1, 1], [], []>} : vector<4x3xf32>, vector<3x256xf32>, vector<4x256xf32> -> vector<4x256xf32>
    %c0_7 = arith.constant 0 : index
    %c0_8 = arith.constant 0 : index
    %10 = vector.load %arg4[%c0_7, %c0_8] : memref<4x2xf32, #tpu.memory_space<vmem>>, vector<4x1xf32>
    %c0_9 = arith.constant 0 : index
    %c1 = arith.constant 1 : index
    %11 = vector.load %arg4[%c0_9, %c1] : memref<4x2xf32, #tpu.memory_space<vmem>>, vector<4x1xf32>
    %12 = vector.broadcast %10 : vector<4x1xf32> to vector<4x256xf32>
    %13 = vector.broadcast %6 : vector<1x256xf32> to vector<4x256xf32>
    %14 = arith.mulf %12, %13 : vector<4x256xf32>
    %15 = arith.addf %9, %14 : vector<4x256xf32>
    %16 = vector.broadcast %11 : vector<4x1xf32> to vector<4x256xf32>
    %17 = arith.addf %15, %16 : vector<4x256xf32>
    %18 = arith.mulf %17, %17 : vector<4x256xf32>
    %cst_10 = arith.constant dense<0.000000e+00> : vector<256xf32>
    %19 = vector.multi_reduction <add>, %18, %cst_10 [0] : vector<4x256xf32> to vector<256xf32>
    %20 = vector.shape_cast %19 : vector<256xf32> to vector<1x256xf32>
    %cst_11 = arith.constant 1.000000e+00 : f32
    %21 = vector.broadcast %cst_11 : f32 to vector<1x256xf32>
    %22 = arith.addf %20, %21 : vector<1x256xf32>
    %23 = math.sqrt %22 : vector<1x256xf32>
    %c0_12 = arith.constant 0 : index
    %c0_13 = arith.constant 0 : index
    %24 = vector.load %arg5[%c0_12, %c0_13] : memref<8x256xf32, #tpu.memory_space<vmem>>, vector<4x256xf32>
    tpu.vector_store %arg5[%c0_12, %c0_13], %17 {strides = array<i32>} : memref<8x256xf32, #tpu.memory_space<vmem>>, vector<4x256xf32>,
    %25 = vector.shape_cast %23 : vector<1x256xf32> to vector<1x256xf32>
    %26 = vector.broadcast %25 : vector<1x256xf32> to vector<4x256xf32>
    %c4 = arith.constant 4 : index
    %c0_14 = arith.constant 0 : index
    %27 = vector.load %arg5[%c4, %c0_14] : memref<8x256xf32, #tpu.memory_space<vmem>>, vector<4x256xf32>
    tpu.vector_store %arg5[%c4, %c0_14], %26 {strides = array<i32>} : memref<8x256xf32, #tpu.memory_space<vmem>>, vector<4x256xf32>,
    return
  }
  func.func @transform_0(%arg0: i32) -> (i32, i32) {
    %c0_i32 = arith.constant 0 : i32
    %c0_i32_0 = arith.constant 0 : i32
    return %c0_i32, %arg0 : i32, i32
  }
  func.func @transform_1(%arg0: i32) -> (i32, i32) {
    %c0_i32 = arith.constant 0 : i32
    %c0_i32_0 = arith.constant 0 : i32
    return %c0_i32, %arg0 : i32, i32
  }
  func.func @transform_2(%arg0: i32) -> (i32, i32) {
    %c0_i32 = arith.constant 0 : i32
    %c0_i32_0 = arith.constant 0 : i32
    %c0_i32_1 = arith.constant 0 : i32
    return %c0_i32, %c0_i32_0 : i32, i32
  }
  func.func @transform_3(%arg0: i32) -> (i32, i32) {
    %c0_i32 = arith.constant 0 : i32
    %c0_i32_0 = arith.constant 0 : i32
    %c0_i32_1 = arith.constant 0 : i32
    return %c0_i32, %c0_i32_0 : i32, i32
  }
  func.func @transform_4(%arg0: i32) -> (i32, i32) {
    %c0_i32 = arith.constant 0 : i32
    %c0_i32_0 = arith.constant 0 : i32
    return %c0_i32, %arg0 : i32, i32
  }
}

</mosaic_0001>

<bundles_post_ra>
// kernel: tpu_custom_call.1
= control target key start
LH: loop header
LB: loop body
LE: loop exit
PB: predicated region body
PF: predicated region fallthrough
CT: control target
= control target key end

     0   :  { %9 = vsyncpa [#allocation3], 0  ;;  %s852_s0 = inlined_call_operand.vmem [shape: f32[1,512], index: 0, kind: input, shape index: {}]   ;;  %s853_s1 = inlined_call_operand.hbm [shape: f32[3,512], index: 1, kind: input, shape index: {}]   ;;  %s854_s2 = inlined_call_operand.vmem [shape: f32[4,3], index: 2, kind: input, shape index: {}]   ;;  %s855_s3 = inlined_call_operand.vmem [shape: f32[4,2], index: 3, kind: input, shape index: {}]   ;;  %s856_s4 = inlined_call_operand.hbm [shape: f32[8,512], index: 4, kind: output, shape index: {}]  }
   0x1   :  { %11 = vsyncpa [#allocation3 + $0x1], 0 }
   0x2   :  { %12 = vsyncpa [#allocation4], 0 }
   0x3   :  { %14 = vsyncpa [#allocation4 + $0x1], 0  ;;  %s687_s15 = smov 0   ;;  %s689_s16 = smov 0  }
   0x4   :  { %s691_s17 = smov 0   ;;  %s693_s18 = smov 0  }
   0x5 LB: > { %s708_s19 = sadd.s32 4294967295, %s655_s18   ;;  %s485_s20 = sadd.s32 4294967294, %s655_s18   ;;  %s655_s18 = sphi %s693_s18, %s873_s18   ;;  %s651_s17 = sphi %s691_s17, %s872_s17   ;;  %s647_s16 = sphi %s689_s16, %s871_s16   ;;  %s643_s15 = sphi %s687_s15, %s870_s15  }
   0x6   : > { %s712_s21 = sadd.s32 1, %s655_s18   ;;  %s53_s22 = sadd.s32 1, %s651_s17 }
   0x7   : > { %s50_s23 = ssub.s32 %s655_s18, %s712_s21  ;;  %p60_p0 = scmp.ne.s32.totalorder %s651_s17, %s647_s16 }
   0x8   : > { %p51_p1 = scmp.eq.s32.totalorder %s50_s23, 0  ;;  %p61_p2 = scmp.eq.s32.totalorder %s655_s18, 0 }
   0x9   : > { %p66_p3 = scmp.ne.s32.totalorder %s647_s16, %s643_s15  ;;  %p67_p4 = scmp.eq.s32.totalorder %s708_s19, 0 }
   0xa   : > { %s724_s24 = scalar_select %p51_p1, %s651_s17, %s53_s22  }
   0xb   : > { %p726_p5 = por %p61_p2, %p60_p0  ;;  %p730_p6 = por %p67_p4, %p66_p3 }
   0xc   : > { %p132_p7 = scmp.eq.s32.totalorder %s708_s19, 1  ;;  %p138_p8 = scmp.eq.s32.totalorder %s485_s20, 1 }
   0xd   : > { %s860_s26 = scalar_select %p730_p6, 1, 0 }
   0xe   : > { %p517_p10 = scmp.lt.s32.totalorder %s655_s18, 2  ;;  %p737_p11 = por %p132_p7, %p60_p0 }
   0xf   : > { %p741_p12 = por %p138_p8, %p66_p3  ;;  %s172_s29 = sand.u32 1, %s651_s17  }
  0x10   : > { %s861_s27 = scalar_select %p737_p11, 1, 0 }
  0x11   : > { %s862_s28 = scalar_select %p741_p12, 1, 0 }
  0x12   : > { %s503_s30 = sshll.u32 %s655_s18, 7  ;;  %s488_s5 = sshll.u32 %s172_s29, 3 }
  0x13   : > { %s750_s8 = scalar_lea.hbm %s853_s1, %s503_s30  ;;  %s176_s9 = scalar_lea.vmem [#allocation2], %s488_s5 }
  0x14   : > { %s184_s10 = sshll.u32 %s176_s9, 4  ;;  %p754_p13 = pnand %p517_p10, %p726_p5  ;;  %s758_s10 = int_to_ptr.vmem [resolvable:$true] %s184_s10 }
  0x15   : > { %s173_s12 = scalar_lea.sflag [#allocation3], %s172_s29  ;;  %s563_s13 = scalar_lea.hbm %s750_s8, 128 }
  0x16   : > { %p564_p2 = scmp.ne.s32.totalorder %s750_s8, %s563_s13  ;;  %p565_p3 = pneg %p754_p13 }
  0x17   : > { %s568_s22 = scalar_lea.hbm %s853_s1, 256  ;;  %p569_p5 = scmp.lt.s32.totalorder %s750_s8, %s853_s1 }
  0x18   : > { %p566_p4 = pnand %p565_p3, %p564_p2  ;;  %p570_p8 = scmp.lt.s32.totalorder %s568_s22, %s563_s13 }
  0x1a   : > { %p567_p7 = pneg %p566_p4  ;;  %p571_p10 = por %p570_p8, %p569_p5 }
  0x1c   : > { %p572_p9 = pnand %p571_p10, %p567_p7 }
  0x1e   : > { %575 = shalt.err (!%p572_p9)
}
  0x1f   : > { %s576_s29 = scalar_lea.vmem %s758_s10, 128  ;;  %s657_s30 = smov [#allocation2]  }
  0x20   : > { %p577_p0 = scmp.ne.s32.totalorder %s758_s10, %s576_s29  ;;  %s581_s5 = sshll.u32 %s657_s30, 4  ;;  %s582_s5 = int_to_ptr.vmem [resolvable:$false] %s581_s5 }
  0x21   : > { %s583_s6 = scalar_lea.vmem %s582_s5, 256  ;;  %p584_p4 = scmp.lt.s32.totalorder %s758_s10, %s582_s5 }
  0x22   : > { %p579_p1 = pnand %p577_p0, %p565_p3  ;;  %p585_p12 = scmp.lt.s32.totalorder %s583_s6, %s576_s29 }
  0x24   : > { %p580_p2 = pneg %p579_p1  ;;  %p586_p11 = por %p585_p12, %p584_p4 }
  0x26   : > { %p587_p6 = pnand %p586_p11, %p580_p2 }
  0x28   : > { %590 = shalt.err (!%p587_p6)
}
  0x29   : > { %512 = dma.hbm_to_vmem [thread:$0]  (!%p754_p13), %s750_s8, 128, %s758_s10, %s173_s12  }
  0x2a   : > { %p864_p9 = scmp.lt.s32.totalorder %s655_s18, 3  ;;  %p865_p7 = scmp.ge.s32.totalorder %s655_s18, 1 }
  0x2c   : > { %p190_p0 = pnand %p865_p7, %p864_p9 }
  0x2d   : > { %s785_s7 = sand.u32 (!%p190_p0), 1, %s647_s16   ;;  %p866_p6 = scmp.ne.s32.totalorder (!%p190_p0), %s860_s26, 0 }
  0x2e   : > { %193 = sbr.rel (%p190_p0) target bundleno = 304 (0x130), region = 36  ;;  %s492_s9 = sshll.u32 (!%p190_p0), %s785_s7, 3 }
  0x2f   : > { %s196_s13 = scalar_lea.sflag (!%p190_p0), [#allocation3], %s785_s7  ;;  %s199_s14 = scalar_lea.vmem (!%p190_p0), [#allocation2], %s492_s9 }
  0x33   : > { %634 = dma.done.wait (%p866_p6), %s196_s13, 128  }
  0x34   : > { %636 = vsyncadd (%p866_p6), %s196_s13, 4294967168  ;;  %v658_v0 = vmov 0.0   ;;  %v659_v1 = vmov 0   ;;  %v246_v2 = vld [vmem:[%s199_s14] sm:$0x77]  ;;  %vm272_vm0 = vcmask 1042432   ;;  %v254_v10 = vlaneseq }
  0x35   : > { %341 = vmatprep.mubr.f32.mxu0 %v658_v0  ;;  %554 = vset.pattern.permute.xlu0 %v659_v1  ;;  %v247_v3 = vld [vmem:[%s855_s3] sm:$0xf]  ;;  %v267_v4 = vcombine.high %v246_v2, %v246_v2  ;;  %vm268_vm1 = vcmask 23552   ;;  %v660_v6 = vmov 1   ;;  %s494_s26 = sshll.u32 %s708_s19, 1  ;;  %s493_s25 = sshll.u32 %s785_s7, 4 }
  0x36   : > { %250 = vperm.xlu0 %554, %v247_v3   ;;  %v245_v5 = vld [vmem:[%s854_s2] sm:$0xf]  ;;  %p229_p11 = scmp.lt.s32.totalorder %s494_s26, 3  ;;  %v255_v12 = vshrl.u32 %v254_v10, 7  ;;  %vm356_vm4 = vcmask 1043456   ;;  %s804_s29 = scalar_lea.vmem [#allocation5], %s493_s25 }
  0x37   : > { %495 = vmatprep.subr.msk.mxu0 %vm272_vm0, %v267_v4  ;;  %s504_s30 = sshll.u32 %s708_s19, 8  ;;  %s406_s5 = sshll.u32 %s804_s29, 4  ;;  %s407_s5 = int_to_ptr.vmem [resolvable:$true] %s406_s5 }
  0x38   : > { %496 = vmatpush1.msk.msra.mxu0 %vm272_vm0, %v246_v2  ;;  %s875_s26 = smov (!%p229_p11, %s494_s26), 3  ;;  %v256_v15 = vsub.s32 0, %v255_v12  ;;  %v260_v17 = vsub.s32 1, %v255_v12  ;;  %s814_s13 = scalar_lea.hbm %s856_s4, %s504_s30 }
  0x39   : > { %497 = vmatmul.mubr.msk.f32.vlgmr.msra.gmra.mxu0 %vm268_vm1, %v245_v5  ;;  %s231_s23 = scalar_lea.vmem %s852_s0, %s875_s26  ;;  %s392_s19 = scalar_lea.sflag [#allocation4], %s785_s7 }
  0x3a   : > { %555 = vset.pattern.permute.xlu0 %v660_v6  ;;  %v235_v7 = vld [vmem:[%s231_s23] sm:$0x3]  ;;  %s591_s14 = scalar_lea.vmem %s407_s5, 256  ;;  %p867_p13 = scmp.ne.s32.totalorder %s861_s27, 0 }
  0x3b   : > { %349 = vperm.xlu0 %555, %v247_v3   ;;  %v236_v8 = vmul.f32 %v235_v7, %v235_v7  ;;  %p592_p12 = scmp.ne.s32.totalorder %s407_s5, %s591_s14  ;;  %s661_s8 = smov [#allocation5]  }
  0x3c   : > { %s595_s10 = sshll.u32 %s661_s8, 4  ;;  %s596_s10 = int_to_ptr.vmem [resolvable:$false] %s595_s10 }
  0x3d   : > { %557 = vrsqrt.f32 %v236_v8  ;;  %vm240_vm2 = vcmp.eq.f32.partialorder %v236_v8, inf  ;;  %v243_v13 = vand.u32 2147483648, %v236_v8  ;;  %vm242_vm3 = vcmp.eq.f32.partialorder %v236_v8, 0.0  ;;  %p593_p1 = pnand %p592_p12, %p867_p13  ;;  %s597_s11 = scalar_lea.vmem %s596_s10, 512 }
  0x3e   : > { %p598_p5 = scmp.lt.s32.totalorder %s407_s5, %s596_s10  ;;  %p599_p8 = scmp.lt.s32.totalorder %s597_s11, %s591_s14 }
  0x3f   : > { %p594_p3 = pneg %p593_p1 }
  0x40   : > { %p600_p10 = por %p599_p8, %p598_p5 }
  0x42   : > { %p601_p2 = pnand %p600_p10, %p594_p3 }
  0x4a   : > { %v558_v9 = vpop.eup %557 }
  0x4b   : > { %v239_v11 = vmul.f32 %v558_v9, %v236_v8 }
  0x4d   : > { %v241_v14 = vsel %vm240_vm2, %v236_v8, %v239_v11 }
  0x4e   : > { %v244_v16 = vsel %vm242_vm3, %v243_v13, %v241_v14 }
  0x4f   : > { %v257_v18 = vrot.slane %v244_v16, %v256_v15  ;;  %v261_v20 = vrot.slane %v244_v16, %v260_v17 }
  0xb1   : > { %v251_v19 = vpop.permute.xlu0 %250 }
  0xb2   : > { %v264_v21 = vmul.f32 %v257_v18, %v251_v19  ;;  %v265_v22 = vmul.f32 %v261_v20, %v251_v19 }
  0xb6   : > { %v350_v24 = vpop.permute.xlu0 %349 }
  0xf9   : > { %v343_v23 = vpop.f32.mrf.mxu0 }
  0xfa   : > { %v344_v25 = vadd.f32 %v343_v23, %v264_v21 }
  0xfb   : > { %v345_v26 = vpop.f32.mrf.mxu0 }
  0xfc   : > { %v352_v27 = vadd.f32 %v350_v24, %v344_v25  ;;  %v346_v28 = vadd.f32 %v345_v26, %v265_v22 }
  0xfe   : > { %v354_v29 = vmul.f32 %v352_v27, %v352_v27  ;;  %387 = vst [vmem:[%s804_s29] sm:$0xf] %v352_v27  ;;  %v353_v30 = vadd.f32 %v350_v24, %v346_v28 }
 0x100   : > { %v357_v31 = vsel %vm356_vm4, %v354_v29, 0.0  ;;  %v355_v32 = vmul.f32 %v353_v30, %v353_v30  ;;  %388 = vst [vmem:[%s804_s29 + $0x8] sm:$0xf] %v353_v30 }
 0x101   : > { %v358_v33 = vrot.slane %v357_v31, 4 }
 0x102   : > { %v364_v34 = vsel %vm356_vm4, %v355_v32, 0.0 }
 0x103   : > { %v359_v35 = vadd.f32 %v358_v33, %v357_v31  ;;  %v365_v36 = vrot.slane %v364_v34, 4 }
 0x105   : > { %v360_v37 = vrot.slane %v359_v35, 2  ;;  %v366_v38 = vadd.f32 %v365_v36, %v364_v34 }
 0x107   : > { %v361_v39 = vadd.f32 %v360_v37, %v359_v35  ;;  %v367_v40 = vrot.slane %v366_v38, 2 }
 0x109   : > { %v362_v41 = vrot.slane %v361_v39, 1  ;;  %v368_v42 = vadd.f32 %v367_v40, %v366_v38 }
 0x10b   : > { %v363_v43 = vadd.f32 %v362_v41, %v361_v39  ;;  %v369_v44 = vrot.slane %v368_v42, 1 }
 0x10d   : > { %v371_v45 = vadd.f32 1.0, %v363_v43  ;;  %v370_v46 = vadd.f32 %v369_v44, %v368_v42 }
 0x10f   : > { %559 = vrsqrt.f32 %v371_v45  ;;  %v372_v47 = vadd.f32 1.0, %v370_v46  ;;  %vm375_vm5 = vcmp.eq.f32.partialorder %v371_v45, inf  ;;  %v378_v51 = vand.u32 2147483648, %v371_v45 }
 0x110   : > { %vm377_vm6 = vcmp.eq.f32.partialorder %v371_v45, 0.0 }
 0x111   : > { %561 = vrsqrt.f32 %v372_v47  ;;  %vm382_vm7 = vcmp.eq.f32.partialorder %v372_v47, inf  ;;  %v385_v55 = vand.u32 2147483648, %v372_v47  ;;  %vm384_vm8 = vcmp.eq.f32.partialorder %v372_v47, 0.0 }
 0x11c   : > { %v560_v48 = vpop.eup %559 }
 0x11d   : > { %v374_v49 = vmul.f32 %v560_v48, %v371_v45 }
 0x11e   : > { %v562_v50 = vpop.eup %561 }
 0x11f   : > { %v376_v52 = vsel %vm375_vm5, %v371_v45, %v374_v49  ;;  %v381_v53 = vmul.f32 %v562_v50, %v372_v47 }
 0x120   : > { %v379_v54 = vsel %vm377_vm6, %v378_v51, %v376_v52 }
 0x121   : > { %v383_v56 = vsel %vm382_vm7, %v372_v47, %v381_v53  ;;  %389 = vst [vmem:[%s804_s29] sm:$0xf0] %v379_v54 }
 0x122   : > { %v386_v57 = vsel %vm384_vm8, %v385_v55, %v383_v56 }
 0x123   : > { %390 = vst [vmem:[%s804_s29 + $0x8] sm:$0xf0] %v386_v57 }
 0x124   : > { %604 = shalt.err (!%p601_p2)
}
 0x125   : > { %s605_s12 = scalar_lea.hbm %s814_s13, 256  ;;  %s609_s20 = scalar_lea.hbm %s856_s4, 512 }
 0x126   : > { %p606_p4 = scmp.ne.s32.totalorder %s814_s13, %s605_s12  ;;  %p610_p0 = scmp.lt.s32.totalorder %s814_s13, %s856_s4 }
 0x127   : > { %p611_p6 = scmp.lt.s32.totalorder %s609_s20, %s605_s12 }
 0x128   : > { %p607_p9 = pnand %p606_p4, %p867_p13 }
 0x129   : > { %p612_p11 = por %p611_p6, %p610_p0 }
 0x12a   : > { %p608_p7 = pneg %p607_p9 }
 0x12c   : > { %p613_p12 = pnand %p612_p11, %p608_p7 }
 0x12e   : > { %616 = shalt.err (!%p613_p12)
}
 0x12f   : > { %507 = dma.vmem_to_hbm [thread:$0]  (%p867_p13), %s407_s5, 256, %s814_s13, %s392_s19  }
 0x130 PF: > { %s418_s25 = sand.u32 1, %s643_s15   ;;  %p868_p1 = scmp.ne.s32.totalorder %s862_s28, 0 }
 0x131   : > { %p869_p3 = scmp.ge.s32.totalorder %s655_s18, 2  ;;  %s419_s29 = scalar_lea.sflag [#allocation4], %s418_s25 }
 0x133   : > { %p514_p5 = pnand %p869_p3, %p868_p1 }
 0x135   : > { %p515_p8 = pneg %p514_p5 }
 0x137   : > { %638 = dma.done.wait (%p515_p8), %s419_s29, 256  }
 0x138   : > { %640 = vsyncadd (%p515_p8), %s419_s29, 4294967040  ;;  %p17_p10 = scmp.ge.s32.totalorder %s712_s21, 4   ;;  %s870_s15 = smov %s647_s16 }
 0x139   : > { %s871_s16 = smov %s651_s17  ;;  %s872_s17 = smov %s724_s24 }
 0x13a   : > { %s873_s18 = smov %s712_s21  ;;  %19 = sbr.rel (!%p17_p10) target bundleno = 5 (0x5), region = 84 }
 0x13f   :  { %424 = vsyncpa [#allocation3], 1 }
 0x140   :  { %426 = vsyncpa [#allocation3 + $0x1], 1 }
 0x141   :  { %427 = vsyncpa [#allocation4], 1 }
 0x142   :  { %429 = vsyncpa [#allocation4 + $0x1], 1 }

// kernel: tpu_custom_call.1
= control target key start
LH: loop header
LB: loop body
LE: loop exit
PB: predicated region body
PF: predicated region fallthrough
CT: control target
= control target key end

     0   :  { %9 = vsyncpa [#allocation3], 0  ;;  %s852_s0 = inlined_call_operand.vmem [shape: f32[1,512], index: 0, kind: input, shape index: {}]   ;;  %s853_s1 = inlined_call_operand.hbm [shape: f32[3,512], index: 1, kind: input, shape index: {}]   ;;  %s854_s2 = inlined_call_operand.vmem [shape: f32[4,3], index: 2, kind: input, shape index: {}]   ;;  %s855_s3 = inlined_call_operand.vmem [shape: f32[4,2], index: 3, kind: input, shape index: {}]   ;;  %s856_s4 = inlined_call_operand.hbm [shape: f32[8,512], index: 4, kind: output, shape index: {}]  }
   0x1   :  { %11 = vsyncpa [#allocation3 + $0x1], 0 }
   0x2   :  { %12 = vsyncpa [#allocation4], 0 }
   0x3   :  { %14 = vsyncpa [#allocation4 + $0x1], 0  ;;  %s687_s15 = smov 0   ;;  %s689_s16 = smov 0  }
   0x4   :  { %s691_s17 = smov 0   ;;  %s693_s18 = smov 0  }
   0x5 LB: > { %s708_s19 = sadd.s32 4294967295, %s655_s18   ;;  %s485_s20 = sadd.s32 4294967294, %s655_s18   ;;  %s655_s18 = sphi %s693_s18, %s873_s18   ;;  %s651_s17 = sphi %s691_s17, %s872_s17   ;;  %s647_s16 = sphi %s689_s16, %s871_s16   ;;  %s643_s15 = sphi %s687_s15, %s870_s15  }
   0x6   : > { %s712_s21 = sadd.s32 1, %s655_s18   ;;  %s53_s22 = sadd.s32 1, %s651_s17 }
   0x7   : > { %s50_s23 = ssub.s32 %s655_s18, %s712_s21  ;;  %p60_p0 = scmp.ne.s32.totalorder %s651_s17, %s647_s16 }
   0x8   : > { %p51_p1 = scmp.eq.s32.totalorder %s50_s23, 0  ;;  %p61_p2 = scmp.eq.s32.totalorder %s655_s18, 0 }
   0x9   : > { %p66_p3 = scmp.ne.s32.totalorder %s647_s16, %s643_s15  ;;  %p67_p4 = scmp.eq.s32.totalorder %s708_s19, 0 }
   0xa   : > { %s724_s24 = scalar_select %p51_p1, %s651_s17, %s53_s22  }
   0xb   : > { %p726_p5 = por %p61_p2, %p60_p0  ;;  %p730_p6 = por %p67_p4, %p66_p3 }
   0xc   : > { %p132_p7 = scmp.eq.s32.totalorder %s708_s19, 1  ;;  %p138_p8 = scmp.eq.s32.totalorder %s485_s20, 1 }
   0xd   : > { %s860_s26 = scalar_select %p730_p6, 1, 0 }
   0xe   : > { %p517_p10 = scmp.lt.s32.totalorder %s655_s18, 2  ;;  %p737_p11 = por %p132_p7, %p60_p0 }
   0xf   : > { %p741_p12 = por %p138_p8, %p66_p3  ;;  %s172_s29 = sand.u32 1, %s651_s17  }
  0x10   : > { %s861_s27 = scalar_select %p737_p11, 1, 0 }
  0x11   : > { %s862_s28 = scalar_select %p741_p12, 1, 0 }
  0x12   : > { %s503_s30 = sshll.u32 %s655_s18, 7  ;;  %s488_s5 = sshll.u32 %s172_s29, 3 }
  0x13   : > { %s750_s8 = scalar_lea.hbm %s853_s1, %s503_s30  ;;  %s176_s9 = scalar_lea.vmem [#allocation2], %s488_s5 }
  0x14   : > { %s184_s10 = sshll.u32 %s176_s9, 4  ;;  %p754_p13 = pnand %p517_p10, %p726_p5  ;;  %s758_s10 = int_to_ptr.vmem [resolvable:$true] %s184_s10 }
  0x15   : > { %s173_s12 = scalar_lea.sflag [#allocation3], %s172_s29  ;;  %s563_s13 = scalar_lea.hbm %s750_s8, 128 }
  0x16   : > { %p564_p2 = scmp.ne.s32.totalorder %s750_s8, %s563_s13  ;;  %p565_p3 = pneg %p754_p13 }
  0x17   : > { %s568_s22 = scalar_lea.hbm %s853_s1, 256  ;;  %p569_p5 = scmp.lt.s32.totalorder %s750_s8, %s853_s1 }
  0x18   : > { %p566_p4 = pnand %p565_p3, %p564_p2  ;;  %p570_p8 = scmp.lt.s32.totalorder %s568_s22, %s563_s13 }
  0x1a   : > { %p567_p7 = pneg %p566_p4  ;;  %p571_p10 = por %p570_p8, %p569_p5 }
  0x1c   : > { %p572_p9 = pnand %p571_p10, %p567_p7 }
  0x1e   : > { %575 = shalt.err (!%p572_p9)
}
  0x1f   : > { %s576_s29 = scalar_lea.vmem %s758_s10, 128  ;;  %s657_s30 = smov [#allocation2]  }
  0x20   : > { %p577_p0 = scmp.ne.s32.totalorder %s758_s10, %s576_s29  ;;  %s581_s5 = sshll.u32 %s657_s30, 4  ;;  %s582_s5 = int_to_ptr.vmem [resolvable:$false] %s581_s5 }
  0x21   : > { %s583_s6 = scalar_lea.vmem %s582_s5, 256  ;;  %p584_p4 = scmp.lt.s32.totalorder %s758_s10, %s582_s5 }
  0x22   : > { %p579_p1 = pnand %p577_p0, %p565_p3  ;;  %p585_p12 = scmp.lt.s32.totalorder %s583_s6, %s576_s29 }
  0x24   : > { %p580_p2 = pneg %p579_p1  ;;  %p586_p11 = por %p585_p12, %p584_p4 }
  0x26   : > { %p587_p6 = pnand %p586_p11, %p580_p2 }
  0x28   : > { %590 = shalt.err (!%p587_p6)
}
  0x29   : > { %512 = dma.hbm_to_vmem [thread:$0]  (!%p754_p13), %s750_s8, 128, %s758_s10, %s173_s12  }
  0x2a   : > { %p864_p9 = scmp.lt.s32.totalorder %s655_s18, 3  ;;  %p865_p7 = scmp.ge.s32.totalorder %s655_s18, 1 }
  0x2c   : > { %p190_p0 = pnand %p865_p7, %p864_p9 }
  0x2d   : > { %s785_s7 = sand.u32 (!%p190_p0), 1, %s647_s16   ;;  %p866_p6 = scmp.ne.s32.totalorder (!%p190_p0), %s860_s26, 0 }
  0x2e   : > { %193 = sbr.rel (%p190_p0) target bundleno = 304 (0x130), region = 36  ;;  %s492_s9 = sshll.u32 (!%p190_p0), %s785_s7, 3 }
  0x2f   : > { %s196_s13 = scalar_lea.sflag (!%p190_p0), [#allocation3], %s785_s7  ;;  %s199_s14 = scalar_lea.vmem (!%p190_p0), [#allocation2], %s492_s9 }
  0x33   : > { %634 = dma.done.wait (%p866_p6), %s196_s13, 128  }
  0x34   : > { %636 = vsyncadd (%p866_p6), %s196_s13, 4294967168  ;;  %v658_v0 = vmov 0.0   ;;  %v659_v1 = vmov 0   ;;  %v246_v2 = vld [vmem:[%s199_s14] sm:$0x77]  ;;  %vm272_vm0 = vcmask 1042432   ;;  %v254_v10 = vlaneseq }
  0x35   : > { %341 = vmatprep.mubr.f32.mxu0 %v658_v0  ;;  %554 = vset.pattern.permute.xlu0 %v659_v1  ;;  %v247_v3 = vld [vmem:[%s855_s3] sm:$0xf]  ;;  %v267_v4 = vcombine.high %v246_v2, %v246_v2  ;;  %vm268_vm1 = vcmask 23552   ;;  %v660_v6 = vmov 1   ;;  %s494_s26 = sshll.u32 %s708_s19, 1  ;;  %s493_s25 = sshll.u32 %s785_s7, 4 }
  0x36   : > { %250 = vperm.xlu0 %554, %v247_v3   ;;  %v245_v5 = vld [vmem:[%s854_s2] sm:$0xf]  ;;  %p229_p11 = scmp.lt.s32.totalorder %s494_s26, 3  ;;  %v255_v12 = vshrl.u32 %v254_v10, 7  ;;  %vm356_vm4 = vcmask 1043456   ;;  %s804_s29 = scalar_lea.vmem [#allocation5], %s493_s25 }
  0x37   : > { %495 = vmatprep.subr.msk.mxu0 %vm272_vm0, %v267_v4  ;;  %s504_s30 = sshll.u32 %s708_s19, 8  ;;  %s406_s5 = sshll.u32 %s804_s29, 4  ;;  %s407_s5 = int_to_ptr.vmem [resolvable:$true] %s406_s5 }
  0x38   : > { %496 = vmatpush1.msk.msra.mxu0 %vm272_vm0, %v246_v2  ;;  %s875_s26 = smov (!%p229_p11, %s494_s26), 3  ;;  %v256_v15 = vsub.s32 0, %v255_v12  ;;  %v260_v17 = vsub.s32 1, %v255_v12  ;;  %s814_s13 = scalar_lea.hbm %s856_s4, %s504_s30 }
  0x39   : > { %497 = vmatmul.mubr.msk.f32.vlgmr.msra.gmra.mxu0 %vm268_vm1, %v245_v5  ;;  %s231_s23 = scalar_lea.vmem %s852_s0, %s875_s26  ;;  %s392_s19 = scalar_lea.sflag [#allocation4], %s785_s7 }
  0x3a   : > { %555 = vset.pattern.permute.xlu0 %v660_v6  ;;  %v235_v7 = vld [vmem:[%s231_s23] sm:$0x3]  ;;  %s591_s14 = scalar_lea.vmem %s407_s5, 256  ;;  %p867_p13 = scmp.ne.s32.totalorder %s861_s27, 0 }
  0x3b   : > { %349 = vperm.xlu0 %555, %v247_v3   ;;  %v236_v8 = vmul.f32 %v235_v7, %v235_v7  ;;  %p592_p12 = scmp.ne.s32.totalorder %s407_s5, %s591_s14  ;;  %s661_s8 = smov [#allocation5]  }
  0x3c   : > { %s595_s10 = sshll.u32 %s661_s8, 4  ;;  %s596_s10 = int_to_ptr.vmem [resolvable:$false] %s595_s10 }
  0x3d   : > { %557 = vrsqrt.f32 %v236_v8  ;;  %vm240_vm2 = vcmp.eq.f32.partialorder %v236_v8, inf  ;;  %v243_v13 = vand.u32 2147483648, %v236_v8  ;;  %vm242_vm3 = vcmp.eq.f32.partialorder %v236_v8, 0.0  ;;  %p593_p1 = pnand %p592_p12, %p867_p13  ;;  %s597_s11 = scalar_lea.vmem %s596_s10, 512 }
  0x3e   : > { %p598_p5 = scmp.lt.s32.totalorder %s407_s5, %s596_s10  ;;  %p599_p8 = scmp.lt.s32.totalorder %s597_s11, %s591_s14 }
  0x3f   : > { %p594_p3 = pneg %p593_p1 }
  0x40   : > { %p600_p10 = por %p599_p8, %p598_p5 }
  0x42   : > { %p601_p2 = pnand %p600_p10, %p594_p3 }
  0x4a   : > { %v558_v9 = vpop.eup %557 }
  0x4b   : > { %v239_v11 = vmul.f32 %v558_v9, %v236_v8 }
  0x4d   : > { %v241_v14 = vsel %vm240_vm2, %v236_v8, %v239_v11 }
  0x4e   : > { %v244_v16 = vsel %vm242_vm3, %v243_v13, %v241_v14 }
  0x4f   : > { %v257_v18 = vrot.slane %v244_v16, %v256_v15  ;;  %v261_v20 = vrot.slane %v244_v16, %v260_v17 }
  0xb1   : > { %v251_v19 = vpop.permute.xlu0 %250 }
  0xb2   : > { %v264_v21 = vmul.f32 %v257_v18, %v251_v19  ;;  %v265_v22 = vmul.f32 %v261_v20, %v251_v19 }
  0xb6   : > { %v350_v24 = vpop.permute.xlu0 %349 }
  0xf9   : > { %v343_v23 = vpop.f32.mrf.mxu0 }
  0xfa   : > { %v344_v25 = vadd.f32 %v343_v23, %v264_v21 }
  0xfb   : > { %v345_v26 = vpop.f32.mrf.mxu0 }
  0xfc   : > { %v352_v27 = vadd.f32 %v350_v24, %v344_v25  ;;  %v346_v28 = vadd.f32 %v345_v26, %v265_v22 }
  0xfe   : > { %v354_v29 = vmul.f32 %v352_v27, %v352_v27  ;;  %387 = vst [vmem:[%s804_s29] sm:$0xf] %v352_v27  ;;  %v353_v30 = vadd.f32 %v350_v24, %v346_v28 }
 0x100   : > { %v357_v31 = vsel %vm356_vm4, %v354_v29, 0.0  ;;  %v355_v32 = vmul.f32 %v353_v30, %v353_v30  ;;  %388 = vst [vmem:[%s804_s29 + $0x8] sm:$0xf] %v353_v30 }
 0x101   : > { %v358_v33 = vrot.slane %v357_v31, 4 }
 0x102   : > { %v364_v34 = vsel %vm356_vm4, %v355_v32, 0.0 }
 0x103   : > { %v359_v35 = vadd.f32 %v358_v33, %v357_v31  ;;  %v365_v36 = vrot.slane %v364_v34, 4 }
 0x105   : > { %v360_v37 = vrot.slane %v359_v35, 2  ;;  %v366_v38 = vadd.f32 %v365_v36, %v364_v34 }
 0x107   : > { %v361_v39 = vadd.f32 %v360_v37, %v359_v35  ;;  %v367_v40 = vrot.slane %v366_v38, 2 }
 0x109   : > { %v362_v41 = vrot.slane %v361_v39, 1  ;;  %v368_v42 = vadd.f32 %v367_v40, %v366_v38 }
 0x10b   : > { %v363_v43 = vadd.f32 %v362_v41, %v361_v39  ;;  %v369_v44 = vrot.slane %v368_v42, 1 }
 0x10d   : > { %v371_v45 = vadd.f32 1.0, %v363_v43  ;;  %v370_v46 = vadd.f32 %v369_v44, %v368_v42 }
 0x10f   : > { %559 = vrsqrt.f32 %v371_v45  ;;  %v372_v47 = vadd.f32 1.0, %v370_v46  ;;  %vm375_vm5 = vcmp.eq.f32.partialorder %v371_v45, inf  ;;  %v378_v51 = vand.u32 2147483648, %v371_v45 }
 0x110   : > { %vm377_vm6 = vcmp.eq.f32.partialorder %v371_v45, 0.0 }
 0x111   : > { %561 = vrsqrt.f32 %v372_v47  ;;  %vm382_vm7 = vcmp.eq.f32.partialorder %v372_v47, inf  ;;  %v385_v55 = vand.u32 2147483648, %v372_v47  ;;  %vm384_vm8 = vcmp.eq.f32.partialorder %v372_v47, 0.0 }
 0x11c   : > { %v560_v48 = vpop.eup %559 }
 0x11d   : > { %v374_v49 = vmul.f32 %v560_v48, %v371_v45 }
 0x11e   : > { %v562_v50 = vpop.eup %561 }
 0x11f   : > { %v376_v52 = vsel %vm375_vm5, %v371_v45, %v374_v49  ;;  %v381_v53 = vmul.f32 %v562_v50, %v372_v47 }
 0x120   : > { %v379_v54 = vsel %vm377_vm6, %v378_v51, %v376_v52 }
 0x121   : > { %v383_v56 = vsel %vm382_vm7, %v372_v47, %v381_v53  ;;  %389 = vst [vmem:[%s804_s29] sm:$0xf0] %v379_v54 }
 0x122   : > { %v386_v57 = vsel %vm384_vm8, %v385_v55, %v383_v56 }
 0x123   : > { %390 = vst [vmem:[%s804_s29 + $0x8] sm:$0xf0] %v386_v57 }
 0x124   : > { %604 = shalt.err (!%p601_p2)
}
 0x125   : > { %s605_s12 = scalar_lea.hbm %s814_s13, 256  ;;  %s609_s20 = scalar_lea.hbm %s856_s4, 512 }
 0x126   : > { %p606_p4 = scmp.ne.s32.totalorder %s814_s13, %s605_s12  ;;  %p610_p0 = scmp.lt.s32.totalorder %s814_s13, %s856_s4 }
 0x127   : > { %p611_p6 = scmp.lt.s32.totalorder %s609_s20, %s605_s12 }
 0x128   : > { %p607_p9 = pnand %p606_p4, %p867_p13 }
 0x129   : > { %p612_p11 = por %p611_p6, %p610_p0 }
 0x12a   : > { %p608_p7 = pneg %p607_p9 }
 0x12c   : > { %p613_p12 = pnand %p612_p11, %p608_p7 }
 0x12e   : > { %616 = shalt.err (!%p613_p12)
}
 0x12f   : > { %507 = dma.vmem_to_hbm [thread:$0]  (%p867_p13), %s407_s5, 256, %s814_s13, %s392_s19  }
 0x130 PF: > { %s418_s25 = sand.u32 1, %s643_s15   ;;  %p868_p1 = scmp.ne.s32.totalorder %s862_s28, 0 }
 0x131   : > { %p869_p3 = scmp.ge.s32.totalorder %s655_s18, 2  ;;  %s419_s29 = scalar_lea.sflag [#allocation4], %s418_s25 }
 0x133   : > { %p514_p5 = pnand %p869_p3, %p868_p1 }
 0x135   : > { %p515_p8 = pneg %p514_p5 }
 0x137   : > { %638 = dma.done.wait (%p515_p8), %s419_s29, 256  }
 0x138   : > { %640 = vsyncadd (%p515_p8), %s419_s29, 4294967040  ;;  %p17_p10 = scmp.ge.s32.totalorder %s712_s21, 4   ;;  %s870_s15 = smov %s647_s16 }
 0x139   : > { %s871_s16 = smov %s651_s17  ;;  %s872_s17 = smov %s724_s24 }
 0x13a   : > { %s873_s18 = smov %s712_s21  ;;  %19 = sbr.rel (!%p17_p10) target bundleno = 5 (0x5), region = 84 }
 0x13f   :  { %424 = vsyncpa [#allocation3], 1 }
 0x140   :  { %426 = vsyncpa [#allocation3 + $0x1], 1 }
 0x141   :  { %427 = vsyncpa [#allocation4], 1 }
 0x142   :  { %429 = vsyncpa [#allocation4 + $0x1], 1 }

</bundles_post_ra>
